<compile_context>
chip_gen: v5e
topology: v5e:2x2
jax: 0.10.0
libtpu: 0.0.40
codegen_flags: <defaults>
</compile_context>

<pallas_src>
import functools

import jax
import jax.numpy as jnp
from jax.experimental import pallas as pl
from jax.experimental.pallas import tpu as pltpu


def _round_up(x, m):
    return ((x + m - 1) // m) * m


def _choose_tm(batch):
    """Batch tile: tiny batches -> minimal padding; large batches -> big tiles
    (amortize ~0.35us/grid-step, long DMAs) while keeping >= 2 grid steps so
    the 'parallel' batch axis can shard across both v7x TensorCores."""
    b16 = _round_up(max(batch, 1), 16)
    if b16 <= 32:
        return b16
    half = _round_up((b16 + 1) // 2, 16)
    return min(512, half)


# ---------------------------------------------------------------------------
# Kernel
# ---------------------------------------------------------------------------
def vae_fc_kernel(
    x_ref, eps_ref,
    w1_ref, b1_ref, w2_ref, b2_ref,        # fc1 = Linear -> ReLU -> Linear
    wlat_ref, blat_ref,                    # fused fc21|fc22 (mu | logvar)
    w3_ref, b3_ref, w4_ref, b4_ref,        # fc3 = Linear -> ReLU -> Linear
    w5_ref, b5_ref,                        # fc4
    recon_ref, lat_ref,
    *, z_dim,
):
    # x ships f32 from HBM; cast to bf16 here (no wrapper-side cast pass).
    x = x_ref[...].astype(jnp.bfloat16)                   # (TM, IN)

    # Hoist bias reads once (no per-matmul re-broadcast).
    b1 = b1_ref[...]
    b2 = b2_ref[...]
    blat = blat_ref[...]
    b3 = b3_ref[...]
    b4 = b4_ref[...]
    b5 = b5_ref[...]

    # ---- encode: h1 = relu(L2(relu(L1(x)))) ----
    h = jnp.dot(x, w1_ref[...], preferred_element_type=jnp.float32) + b1
    h = jnp.maximum(h, 0.0).astype(jnp.bfloat16)
    h1 = jnp.dot(h, w2_ref[...], preferred_element_type=jnp.float32) + b2
    h1 = jnp.maximum(h1, 0.0)

    # ---- fused latent head (f32, tiny): mu in lanes [0:z_dim),
    #      logvar in lanes [z_dim:2*z_dim), remaining lanes zero ----
    lat = jnp.dot(h1, wlat_ref[...], preferred_element_type=jnp.float32) + blat
    lat_ref[...] = lat                                     # single lane-dense output

    # ---- reparameterize on just the z_dim useful lanes (f32, EUP/VPU) ----
    mu_z = lat[:, :z_dim]                                  # (TM, z_dim)
    lv_z = lat[:, z_dim:2 * z_dim]                         # (TM, z_dim)
    z = eps_ref[...] * jnp.exp(0.5 * lv_z) + mu_z          # (TM, z_dim)

    # ---- decode ----
    # fc3[0] has K = z_dim (=2): broadcasted VPU FMAs, not an MXU pass.
    # Rows read straight from the (small) ref; no full-slab materialization.
    h3 = b3                                                # (1, HP) f32
    for j in range(z_dim):                                 # static, tiny
        h3 = h3 + z[:, j:j + 1] * w3_ref[j:j + 1, :]
    h3 = jnp.maximum(h3, 0.0).astype(jnp.bfloat16)

    h3 = jnp.dot(h3, w4_ref[...], preferred_element_type=jnp.float32) + b4
    h3 = jnp.maximum(h3, 0.0).astype(jnp.bfloat16)

    recon = jnp.tanh(jnp.dot(h3, w5_ref[...],
                             preferred_element_type=jnp.float32) + b5)
    recon_ref[...] = recon.astype(recon_ref.dtype)


# ---------------------------------------------------------------------------
# Wrapper
# ---------------------------------------------------------------------------
@functools.partial(jax.jit, static_argnames=("tm", "recon_dtype"))
def vaefc_conv_forward(x, eps, packed_params, tm=None, recon_dtype=jnp.bfloat16):
    """x: (B, N, N) f32, eps: (B, z_dim) f32, packed_params from pack_params().

    tm: batch tile (rows per grid step); None -> auto (round_up(B,16) for
    small B, up to 512 rows with >= 2 grid steps for large B).
    recon_dtype: dtype of the reconstruction output (bf16 halves the largest
    HBM write stream; pass jnp.float32 if exact-f32 output is required).
    """
    B, N, _ = x.shape
    input_dim = N * N
    z_dim = eps.shape[1]
    lat_w = _round_up(2 * z_dim, 128)          # merged mu|logvar slab width
    assert input_dim % 128 == 0, "input_dim must be lane-aligned"

    if tm is None:
        tm = _choose_tm(B)
    b_pad = _round_up(max(B, 1), tm)

    x_flat = x.reshape(B, input_dim)           # f32; cast happens in-kernel
    eps_f = eps.astype(jnp.float32)
    if b_pad != B:                             # only pad when a tail exists
        x_flat = jnp.zeros((b_pad, input_dim), x_flat.dtype).at[:B].set(x_flat)
        eps_f = jnp.zeros((b_pad, z_dim), jnp.float32).at[:B].set(eps_f)

    grid = (b_pad // tm,)

    def batch_spec(width):
        return pl.BlockSpec((tm, width), lambda i: (i, 0))

    # Weights/biases: full-array block, constant index_map -> VMEM-resident.
    weight_specs = [pl.BlockSpec(p.shape, lambda i: (0, 0)) for p in packed_params]

    in_specs = [batch_spec(input_dim), batch_spec(z_dim)] + weight_specs
    out_specs = (batch_spec(input_dim), batch_spec(lat_w))
    out_shapes = (
        jax.ShapeDtypeStruct((b_pad, input_dim), recon_dtype),  # recon
        jax.ShapeDtypeStruct((b_pad, lat_w), jnp.float32),      # mu|logvar slab
    )

    kernel = functools.partial(vae_fc_kernel, z_dim=z_dim)
    recon, lat = pl.pallas_call(
        kernel,
        grid=grid,
        in_specs=in_specs,
        out_specs=out_specs,
        out_shape=out_shapes,
        compiler_params=pltpu.CompilerParams(
            dimension_semantics=("parallel",),
        ),
    )(x_flat, eps_f, *packed_params)

    mu = lat[:B, :z_dim]
    logvar = lat[:B, z_dim:2 * z_dim]
    return recon[:B], mu, logvar


# ---------------------------------------------------------------------------
# Parameter init / packing
# ---------------------------------------------------------------------------
def init_params(key, input_dim, hidden_dim, z_dim):
    """PyTorch-style uniform init; weights stored (in_features, out_features)."""
    def linear(k, fan_in, fan_out):
        kw, kb = jax.random.split(k)
        bound = 1.0 / (fan_in ** 0.5)
        w = jax.random.uniform(kw, (fan_in, fan_out), jnp.float32, -bound, bound)
        b = jax.random.uniform(kb, (1, fan_out), jnp.float32, -bound, bound)
        return w, b

    keys = jax.random.split(key, 7)
    w1, b1 = linear(keys[0], input_dim, hidden_dim)    # fc1[0]
    w2, b2 = linear(keys[1], hidden_dim, hidden_dim)   # fc1[2]
    w21, b21 = linear(keys[2], hidden_dim, z_dim)      # fc21
    w22, b22 = linear(keys[3], hidden_dim, z_dim)      # fc22
    w3, b3 = linear(keys[4], z_dim, hidden_dim)        # fc3[0]
    w4, b4 = linear(keys[5], hidden_dim, hidden_dim)   # fc3[2]
    w5, b5 = linear(keys[6], hidden_dim, input_dim)    # fc4
    return (w1, b1, w2, b2, w21, b21, w22, b22, w3, b3, w4, b4, w5, b5)


def pack_params(params, input_dim, hidden_dim, z_dim):
    """Zero-pad hidden->128, fuse fc21|fc22 into one 128-lane head, shrink
    fc3[0] to its used rows, cast big matmul weights to bf16."""
    (w1, b1, w2, b2, w21, b21, w22, b22, w3, b3, w4, b4, w5, b5) = params
    hp = _round_up(hidden_dim, 128)
    lat_w = _round_up(2 * z_dim, 128)
    zr = _round_up(z_dim, 8)

    def pad2(a, r, c):
        return jnp.zeros((r, c), jnp.float32).at[:a.shape[0], :a.shape[1]].set(a)

    w1p = pad2(w1, input_dim, hp).astype(jnp.bfloat16)
    b1p = pad2(b1, 1, hp)
    w2p = pad2(w2, hp, hp).astype(jnp.bfloat16)
    b2p = pad2(b2, 1, hp)

    # Fused latent head, one lane-dense slab: mu cols [0:z_dim),
    # logvar cols [z_dim:2*z_dim), rest zero.  Kept f32 (tiny matmul; tighter
    # numerics for logvar -> exp(0.5*logvar)).
    wlat = jnp.zeros((hp, lat_w), jnp.float32)
    wlat = wlat.at[:hidden_dim, :z_dim].set(w21)
    wlat = wlat.at[:hidden_dim, z_dim:2 * z_dim].set(w22)
    blat = jnp.zeros((1, lat_w), jnp.float32)
    blat = blat.at[:, :z_dim].set(b21).at[:, z_dim:2 * z_dim].set(b22)

    # fc3[0]: only the first z_dim rows are ever read (VPU FMA loop);
    # pad rows only to a sublane multiple instead of a full 128-row slab.
    w3p = pad2(w3, zr, hp)                     # f32: consumed on the VPU
    b3p = pad2(b3, 1, hp)
    w4p = pad2(w4, hp, hp).astype(jnp.bfloat16)
    b4p = pad2(b4, 1, hp)
    w5p = pad2(w5, hp, input_dim).astype(jnp.bfloat16)
    b5p = b5.astype(jnp.float32)               # (1, input_dim), lane-clean

    return (w1p, b1p, w2p, b2p, wlat, blat, w3p, b3p, w4p, b4p, w5p, b5p)


# ---------------------------------------------------------------------------
# Pure-JAX f32 reference (mirrors the PyTorch forward)
# ---------------------------------------------------------------------------
def reference_forward(x, eps, params):
    (w1, b1, w2, b2, w21, b21, w22, b22, w3, b3, w4, b4, w5, b5) = params
    B = x.shape[0]
    xf = x.reshape(B, -1)
    h = jnp.maximum(xf @ w1 + b1, 0.0)
    h1 = jnp.maximum(h @ w2 + b2, 0.0)
    mu = h1 @ w21 + b21
    logvar = h1 @ w22 + b22
    z = eps * jnp.exp(0.5 * logvar) + mu
    h3 = jnp.maximum(z @ w3 + b3, 0.0)
    h3 = jnp.maximum(h3 @ w4 + b4, 0.0)
    recon = jnp.tanh(h3 @ w5 + b5)
    return recon, mu, logvar


if __name__ == "__main__":
    N = 16
    HIDDEN = 100
    Z_DIM = 2
    INPUT_DIM = N * N

    key = jax.random.PRNGKey(0)
    k_params, k_x1, k_eps1, k_x2, k_eps2 = jax.random.split(key, 5)

    params = init_params(k_params, INPUT_DIM, HIDDEN, Z_DIM)
    packed = pack_params(params, INPUT_DIM, HIDDEN, Z_DIM)

    # --- small-batch / latency path (auto tm = 16, grid = 1 step) ---
    B1 = 2
    x1 = jax.random.normal(k_x1, (B1, N, N), jnp.float32)
    # eps = torch.randn_like(std): sampled in JAX glue, consumed inside kernel.
    eps1 = jax.random.normal(k_eps1, (B1, Z_DIM), jnp.float32)

    recon1, mu1, lv1 = vaefc_conv_forward(x1, eps1, packed)
    jax.block_until_ready((recon1, mu1, lv1))

    assert recon1.shape == (B1, INPUT_DIM)
    assert mu1.shape == (B1, Z_DIM)
    assert lv1.shape == (B1, Z_DIM)

    r_ref, mu_ref, lv_ref = reference_forward(x1, eps1, params)
    assert bool(jnp.all(jnp.isfinite(recon1.astype(jnp.float32))))
    assert float(jnp.max(jnp.abs(recon1.astype(jnp.float32) - r_ref))) < 0.1
    assert float(jnp.max(jnp.abs(mu1 - mu_ref))) < 0.1
    assert float(jnp.max(jnp.abs(lv1 - lv_ref))) < 0.1

    # --- multi-tile path (auto tm = 160, grid = 2 steps: both v7x TCs) ---
    B2 = 300
    x2 = jax.random.normal(k_x2, (B2, N, N), jnp.float32)
    eps2 = jax.random.normal(k_eps2, (B2, Z_DIM), jnp.float32)

    recon2, mu2, lv2 = vaefc_conv_forward(x2, eps2, packed)
    jax.block_until_ready((recon2, mu2, lv2))

    r2_ref, mu2_ref, lv2_ref = reference_forward(x2, eps2, params)
    assert float(jnp.max(jnp.abs(recon2.astype(jnp.float32) - r2_ref))) < 0.1
    assert float(jnp.max(jnp.abs(mu2 - mu2_ref))) < 0.1
    assert float(jnp.max(jnp.abs(lv2 - lv2_ref))) < 0.1

    print("KERNEL_OK")
</pallas_src>

<mosaic_0001>
module attributes {stable_mosaic.version = 11 : i64} {
  func.func @vae_fc_kernel(%arg0: i32, %arg1: memref<16x256xf32, #tpu.memory_space<vmem>>, %arg2: memref<16x2xf32, #tpu.memory_space<vmem>>, %arg3: memref<256x128xbf16, #tpu.memory_space<vmem>>, %arg4: memref<1x128xf32, #tpu.memory_space<vmem>>, %arg5: memref<128x128xbf16, #tpu.memory_space<vmem>>, %arg6: memref<1x128xf32, #tpu.memory_space<vmem>>, %arg7: memref<128x128xf32, #tpu.memory_space<vmem>>, %arg8: memref<1x128xf32, #tpu.memory_space<vmem>>, %arg9: memref<8x128xf32, #tpu.memory_space<vmem>>, %arg10: memref<1x128xf32, #tpu.memory_space<vmem>>, %arg11: memref<128x128xbf16, #tpu.memory_space<vmem>>, %arg12: memref<1x128xf32, #tpu.memory_space<vmem>>, %arg13: memref<128x256xbf16, #tpu.memory_space<vmem>>, %arg14: memref<1x256xf32, #tpu.memory_space<vmem>>, %arg15: memref<16x256xbf16, #tpu.memory_space<vmem>>, %arg16: memref<16x128xf32, #tpu.memory_space<vmem>>) attributes {dimension_semantics = [#tpu.dimension_semantics<parallel>], iteration_bounds = array<i64: 1>, scalar_prefetch = 0 : i64, scratch_operands = 0 : i64, tpu.core_type = #tpu.core_type<tc>, window_params = [{transform_indices = @transform_0, window_bounds = array<i64: 16, 256>}, {transform_indices = @transform_1, window_bounds = array<i64: 16, 2>}, {pipeline_mode = #tpu.pipeline_mode<synchronous>, transform_indices = @transform_2, window_bounds = array<i64: 256, 128>}, {pipeline_mode = #tpu.pipeline_mode<synchronous>, transform_indices = @transform_3, window_bounds = array<i64: 1, 128>}, {pipeline_mode = #tpu.pipeline_mode<synchronous>, transform_indices = @transform_4, window_bounds = array<i64: 128, 128>}, {pipeline_mode = #tpu.pipeline_mode<synchronous>, transform_indices = @transform_5, window_bounds = array<i64: 1, 128>}, {pipeline_mode = #tpu.pipeline_mode<synchronous>, transform_indices = @transform_6, window_bounds = array<i64: 128, 128>}, {pipeline_mode = #tpu.pipeline_mode<synchronous>, transform_indices = @transform_7, window_bounds = array<i64: 1, 128>}, {pipeline_mode = #tpu.pipeline_mode<synchronous>, transform_indices = @transform_8, window_bounds = array<i64: 8, 128>}, {pipeline_mode = #tpu.pipeline_mode<synchronous>, transform_indices = @transform_9, window_bounds = array<i64: 1, 128>}, {pipeline_mode = #tpu.pipeline_mode<synchronous>, transform_indices = @transform_10, window_bounds = array<i64: 128, 128>}, {pipeline_mode = #tpu.pipeline_mode<synchronous>, transform_indices = @transform_11, window_bounds = array<i64: 1, 128>}, {pipeline_mode = #tpu.pipeline_mode<synchronous>, transform_indices = @transform_12, window_bounds = array<i64: 128, 256>}, {pipeline_mode = #tpu.pipeline_mode<synchronous>, transform_indices = @transform_13, window_bounds = array<i64: 1, 256>}, {transform_indices = @transform_14, window_bounds = array<i64: 16, 256>}, {transform_indices = @transform_15, window_bounds = array<i64: 16, 128>}]} {
    %c0 = arith.constant 0 : index
    %c0_0 = arith.constant 0 : index
    %0 = vector.load %arg1[%c0, %c0_0] : memref<16x256xf32, #tpu.memory_space<vmem>>, vector<16x256xf32>
    %1 = arith.truncf %0 : vector<16x256xf32> to vector<16x256xbf16>
    %c0_1 = arith.constant 0 : index
    %c0_2 = arith.constant 0 : index
    %2 = vector.load %arg4[%c0_1, %c0_2] : memref<1x128xf32, #tpu.memory_space<vmem>>, vector<1x128xf32>
    %c0_3 = arith.constant 0 : index
    %c0_4 = arith.constant 0 : index
    %3 = vector.load %arg6[%c0_3, %c0_4] : memref<1x128xf32, #tpu.memory_space<vmem>>, vector<1x128xf32>
    %c0_5 = arith.constant 0 : index
    %c0_6 = arith.constant 0 : index
    %4 = vector.load %arg8[%c0_5, %c0_6] : memref<1x128xf32, #tpu.memory_space<vmem>>, vector<1x128xf32>
    %c0_7 = arith.constant 0 : index
    %c0_8 = arith.constant 0 : index
    %5 = vector.load %arg10[%c0_7, %c0_8] : memref<1x128xf32, #tpu.memory_space<vmem>>, vector<1x128xf32>
    %c0_9 = arith.constant 0 : index
    %c0_10 = arith.constant 0 : index
    %6 = vector.load %arg12[%c0_9, %c0_10] : memref<1x128xf32, #tpu.memory_space<vmem>>, vector<1x128xf32>
    %c0_11 = arith.constant 0 : index
    %c0_12 = arith.constant 0 : index
    %7 = vector.load %arg14[%c0_11, %c0_12] : memref<1x256xf32, #tpu.memory_space<vmem>>, vector<1x256xf32>
    %c0_13 = arith.constant 0 : index
    %c0_14 = arith.constant 0 : index
    %8 = vector.load %arg3[%c0_13, %c0_14] : memref<256x128xbf16, #tpu.memory_space<vmem>>, vector<256x128xbf16>
    %cst = arith.constant dense<0.000000e+00> : vector<16x128xf32>
    %9 = tpu.matmul %1, %8, %cst {dimension_numbers = #tpu.dot_dimension_numbers<[1], [0], [0], [1], [0, 0, 1, 1], [], []>} : vector<16x256xbf16>, vector<256x128xbf16>, vector<16x128xf32> -> vector<16x128xf32>
    %10 = vector.broadcast %2 : vector<1x128xf32> to vector<16x128xf32>
    %11 = arith.addf %9, %10 : vector<16x128xf32>
    %cst_15 = arith.constant 0.000000e+00 : f32
    %12 = vector.broadcast %cst_15 : f32 to vector<16x128xf32>
    %13 = arith.maximumf %11, %12 : vector<16x128xf32>
    %14 = arith.truncf %13 : vector<16x128xf32> to vector<16x128xbf16>
    %c0_16 = arith.constant 0 : index
    %c0_17 = arith.constant 0 : index
    %15 = vector.load %arg5[%c0_16, %c0_17] : memref<128x128xbf16, #tpu.memory_space<vmem>>, vector<128x128xbf16>
    %cst_18 = arith.constant dense<0.000000e+00> : vector<16x128xf32>
    %16 = tpu.matmul %14, %15, %cst_18 {dimension_numbers = #tpu.dot_dimension_numbers<[1], [0], [0], [1], [0, 0, 1, 1], [], []>} : vector<16x128xbf16>, vector<128x128xbf16>, vector<16x128xf32> -> vector<16x128xf32>
    %17 = vector.broadcast %3 : vector<1x128xf32> to vector<16x128xf32>
    %18 = arith.addf %16, %17 : vector<16x128xf32>
    %cst_19 = arith.constant 0.000000e+00 : f32
    %19 = vector.broadcast %cst_19 : f32 to vector<16x128xf32>
    %20 = arith.maximumf %18, %19 : vector<16x128xf32>
    %c0_20 = arith.constant 0 : index
    %c0_21 = arith.constant 0 : index
    %21 = vector.load %arg7[%c0_20, %c0_21] : memref<128x128xf32, #tpu.memory_space<vmem>>, vector<128x128xf32>
    %cst_22 = arith.constant dense<0.000000e+00> : vector<16x128xf32>
    %22 = tpu.matmul %20, %21, %cst_22 {dimension_numbers = #tpu.dot_dimension_numbers<[1], [0], [0], [1], [0, 0, 1, 1], [], []>} : vector<16x128xf32>, vector<128x128xf32>, vector<16x128xf32> -> vector<16x128xf32>
    %23 = vector.broadcast %4 : vector<1x128xf32> to vector<16x128xf32>
    %24 = arith.addf %22, %23 : vector<16x128xf32>
    %c0_23 = arith.constant 0 : index
    %c0_24 = arith.constant 0 : index
    %25 = vector.load %arg16[%c0_23, %c0_24] : memref<16x128xf32, #tpu.memory_space<vmem>>, vector<16x128xf32>
    tpu.vector_store %arg16[%c0_23, %c0_24], %24 {strides = array<i32>} : memref<16x128xf32, #tpu.memory_space<vmem>>, vector<16x128xf32>,
    %26 = vector.extract_strided_slice %24 {offsets = [0, 0], sizes = [16, 2], strides = [1, 1]} : vector<16x128xf32> to vector<16x2xf32>
    %27 = vector.extract_strided_slice %24 {offsets = [0, 2], sizes = [16, 2], strides = [1, 1]} : vector<16x128xf32> to vector<16x2xf32>
    %c0_25 = arith.constant 0 : index
    %c0_26 = arith.constant 0 : index
    %28 = vector.load %arg2[%c0_25, %c0_26] : memref<16x2xf32, #tpu.memory_space<vmem>>, vector<16x2xf32>
    %cst_27 = arith.constant 5.000000e-01 : f32
    %29 = vector.broadcast %cst_27 : f32 to vector<16x2xf32>
    %30 = arith.mulf %29, %27 : vector<16x2xf32>
    %31 = math.exp %30 : vector<16x2xf32>
    %32 = arith.mulf %28, %31 : vector<16x2xf32>
    %33 = arith.addf %32, %26 : vector<16x2xf32>
    %34 = vector.extract_strided_slice %33 {offsets = [0, 0], sizes = [16, 1], strides = [1, 1]} : vector<16x2xf32> to vector<16x1xf32>
    %c0_28 = arith.constant 0 : index
    %c0_29 = arith.constant 0 : index
    %35 = vector.load %arg9[%c0_28, %c0_29] : memref<8x128xf32, #tpu.memory_space<vmem>>, vector<1x128xf32>
    %36 = vector.broadcast %34 : vector<16x1xf32> to vector<16x128xf32>
    %37 = vector.broadcast %35 : vector<1x128xf32> to vector<16x128xf32>
    %38 = arith.mulf %36, %37 : vector<16x128xf32>
    %39 = vector.broadcast %5 : vector<1x128xf32> to vector<16x128xf32>
    %40 = arith.addf %39, %38 : vector<16x128xf32>
    %41 = vector.extract_strided_slice %33 {offsets = [0, 1], sizes = [16, 1], strides = [1, 1]} : vector<16x2xf32> to vector<16x1xf32>
    %c1 = arith.constant 1 : index
    %c0_30 = arith.constant 0 : index
    %42 = vector.load %arg9[%c1, %c0_30] : memref<8x128xf32, #tpu.memory_space<vmem>>, vector<1x128xf32>
    %43 = vector.broadcast %41 : vector<16x1xf32> to vector<16x128xf32>
    %44 = vector.broadcast %42 : vector<1x128xf32> to vector<16x128xf32>
    %45 = arith.mulf %43, %44 : vector<16x128xf32>
    %46 = arith.addf %40, %45 : vector<16x128xf32>
    %cst_31 = arith.constant 0.000000e+00 : f32
    %47 = vector.broadcast %cst_31 : f32 to vector<16x128xf32>
    %48 = arith.maximumf %46, %47 : vector<16x128xf32>
    %49 = arith.truncf %48 : vector<16x128xf32> to vector<16x128xbf16>
    %c0_32 = arith.constant 0 : index
    %c0_33 = arith.constant 0 : index
    %50 = vector.load %arg11[%c0_32, %c0_33] : memref<128x128xbf16, #tpu.memory_space<vmem>>, vector<128x128xbf16>
    %cst_34 = arith.constant dense<0.000000e+00> : vector<16x128xf32>
    %51 = tpu.matmul %49, %50, %cst_34 {dimension_numbers = #tpu.dot_dimension_numbers<[1], [0], [0], [1], [0, 0, 1, 1], [], []>} : vector<16x128xbf16>, vector<128x128xbf16>, vector<16x128xf32> -> vector<16x128xf32>
    %52 = vector.broadcast %6 : vector<1x128xf32> to vector<16x128xf32>
    %53 = arith.addf %51, %52 : vector<16x128xf32>
    %cst_35 = arith.constant 0.000000e+00 : f32
    %54 = vector.broadcast %cst_35 : f32 to vector<16x128xf32>
    %55 = arith.maximumf %53, %54 : vector<16x128xf32>
    %56 = arith.truncf %55 : vector<16x128xf32> to vector<16x128xbf16>
    %c0_36 = arith.constant 0 : index
    %c0_37 = arith.constant 0 : index
    %57 = vector.load %arg13[%c0_36, %c0_37] : memref<128x256xbf16, #tpu.memory_space<vmem>>, vector<128x256xbf16>
    %cst_38 = arith.constant dense<0.000000e+00> : vector<16x256xf32>
    %58 = tpu.matmul %56, %57, %cst_38 {dimension_numbers = #tpu.dot_dimension_numbers<[1], [0], [0], [1], [0, 0, 1, 1], [], []>} : vector<16x128xbf16>, vector<128x256xbf16>, vector<16x256xf32> -> vector<16x256xf32>
    %59 = vector.broadcast %7 : vector<1x256xf32> to vector<16x256xf32>
    %60 = arith.addf %58, %59 : vector<16x256xf32>
    %61 = math.tanh %60 : vector<16x256xf32>
    %62 = arith.truncf %61 : vector<16x256xf32> to vector<16x256xbf16>
    %c0_39 = arith.constant 0 : index
    %c0_40 = arith.constant 0 : index
    %63 = vector.load %arg15[%c0_39, %c0_40] : memref<16x256xbf16, #tpu.memory_space<vmem>>, vector<16x256xbf16>
    tpu.vector_store %arg15[%c0_39, %c0_40], %62 {strides = array<i32>} : memref<16x256xbf16, #tpu.memory_space<vmem>>, vector<16x256xbf16>,
    return
  }
  func.func @transform_0(%arg0: i32) -> (i32, i32) {
    %c0_i32 = arith.constant 0 : i32
    %c0_i32_0 = arith.constant 0 : i32
    return %arg0, %c0_i32 : i32, i32
  }
  func.func @transform_1(%arg0: i32) -> (i32, i32) {
    %c0_i32 = arith.constant 0 : i32
    %c0_i32_0 = arith.constant 0 : i32
    return %arg0, %c0_i32 : i32, i32
  }
  func.func @transform_2(%arg0: i32) -> (i32, i32) {
    %c0_i32 = arith.constant 0 : i32
    %c0_i32_0 = arith.constant 0 : i32
    %c0_i32_1 = arith.constant 0 : i32
    return %c0_i32, %c0_i32_0 : i32, i32
  }
  func.func @transform_3(%arg0: i32) -> (i32, i32) {
    %c0_i32 = arith.constant 0 : i32
    %c0_i32_0 = arith.constant 0 : i32
    %c0_i32_1 = arith.constant 0 : i32
    return %c0_i32, %c0_i32_0 : i32, i32
  }
  func.func @transform_4(%arg0: i32) -> (i32, i32) {
    %c0_i32 = arith.constant 0 : i32
    %c0_i32_0 = arith.constant 0 : i32
    %c0_i32_1 = arith.constant 0 : i32
    return %c0_i32, %c0_i32_0 : i32, i32
  }
  func.func @transform_5(%arg0: i32) -> (i32, i32) {
    %c0_i32 = arith.constant 0 : i32
    %c0_i32_0 = arith.constant 0 : i32
    %c0_i32_1 = arith.constant 0 : i32
    return %c0_i32, %c0_i32_0 : i32, i32
  }
  func.func @transform_6(%arg0: i32) -> (i32, i32) {
    %c0_i32 = arith.constant 0 : i32
    %c0_i32_0 = arith.constant 0 : i32
    %c0_i32_1 = arith.constant 0 : i32
    return %c0_i32, %c0_i32_0 : i32, i32
  }
  func.func @transform_7(%arg0: i32) -> (i32, i32) {
    %c0_i32 = arith.constant 0 : i32
    %c0_i32_0 = arith.constant 0 : i32
    %c0_i32_1 = arith.constant 0 : i32
    return %c0_i32, %c0_i32_0 : i32, i32
  }
  func.func @transform_8(%arg0: i32) -> (i32, i32) {
    %c0_i32 = arith.constant 0 : i32
    %c0_i32_0 = arith.constant 0 : i32
    %c0_i32_1 = arith.constant 0 : i32
    return %c0_i32, %c0_i32_0 : i32, i32
  }
  func.func @transform_9(%arg0: i32) -> (i32, i32) {
    %c0_i32 = arith.constant 0 : i32
    %c0_i32_0 = arith.constant 0 : i32
    %c0_i32_1 = arith.constant 0 : i32
    return %c0_i32, %c0_i32_0 : i32, i32
  }
  func.func @transform_10(%arg0: i32) -> (i32, i32) {
    %c0_i32 = arith.constant 0 : i32
    %c0_i32_0 = arith.constant 0 : i32
    %c0_i32_1 = arith.constant 0 : i32
    return %c0_i32, %c0_i32_0 : i32, i32
  }
  func.func @transform_11(%arg0: i32) -> (i32, i32) {
    %c0_i32 = arith.constant 0 : i32
    %c0_i32_0 = arith.constant 0 : i32
    %c0_i32_1 = arith.constant 0 : i32
    return %c0_i32, %c0_i32_0 : i32, i32
  }
  func.func @transform_12(%arg0: i32) -> (i32, i32) {
    %c0_i32 = arith.constant 0 : i32
    %c0_i32_0 = arith.constant 0 : i32
    %c0_i32_1 = arith.constant 0 : i32
    return %c0_i32, %c0_i32_0 : i32, i32
  }
  func.func @transform_13(%arg0: i32) -> (i32, i32) {
    %c0_i32 = arith.constant 0 : i32
    %c0_i32_0 = arith.constant 0 : i32
    %c0_i32_1 = arith.constant 0 : i32
    return %c0_i32, %c0_i32_0 : i32, i32
  }
  func.func @transform_14(%arg0: i32) -> (i32, i32) {
    %c0_i32 = arith.constant 0 : i32
    %c0_i32_0 = arith.constant 0 : i32
    return %arg0, %c0_i32 : i32, i32
  }
  func.func @transform_15(%arg0: i32) -> (i32, i32) {
    %c0_i32 = arith.constant 0 : i32
    %c0_i32_0 = arith.constant 0 : i32
    return %arg0, %c0_i32 : i32, i32
  }
}

</mosaic_0001>

<bundles_post_ra>
// kernel: vaefc_conv_forward.1
= control target key start
LH: loop header
LB: loop body
LE: loop exit
PB: predicated region body
PF: predicated region fallthrough
CT: control target
= control target key end

     0   :  { %21 = vsyncpa [#allocation3], 0  ;;  %s1257_s0 = inlined_call_operand.vmem [shape: f32[16,256], index: 0, kind: input, shape index: {}]   ;;  %s1258_s1 = inlined_call_operand.vmem [shape: f32[16,2], index: 1, kind: input, shape index: {}]   ;;  %s1259_s2 = inlined_call_operand.hbm [shape: bf16[256,128], index: 2, kind: input, shape index: {}]   ;;  %s1260_s3 = inlined_call_operand.vmem [shape: f32[1,128], index: 3, kind: input, shape index: {}]   ;;  %s1261_s4 = inlined_call_operand.vmem [shape: bf16[128,128], index: 4, kind: input, shape index: {}]   ;;  %s1262_s5 = inlined_call_operand.vmem [shape: f32[1,128], index: 5, kind: input, shape index: {}]   ;;  %s1263_s6 = inlined_call_operand.hbm [shape: f32[128,128], index: 6, kind: input, shape index: {}]   ;;  %s1264_s7 = inlined_call_operand.vmem [shape: f32[1,128], index: 7, kind: input, shape index: {}]   ;;  %s1265_s8 = inlined_call_operand.vmem [shape: f32[8,128], index: 8, kind: input, shape index: {}]   ;;  %s1266_s9 = inlined_call_operand.vmem [shape: f32[1,128], index: 9, kind: input, shape index: {}]   ;;  %s1267_s10 = inlined_call_operand.hbm [shape: bf16[128,128], index: 10, kind: input, shape index: {}]   ;;  %s1268_s11 = inlined_call_operand.vmem [shape: f32[1,128], index: 11, kind: input, shape index: {}]   ;;  %s1269_s12 = inlined_call_operand.hbm [shape: bf16[128,256], index: 12, kind: input, shape index: {}]   ;;  %s1270_s13 = inlined_call_operand.vmem [shape: f32[1,256], index: 13, kind: input, shape index: {}]   ;;  %s1271_s14 = inlined_call_operand.vmem [shape: bf16[16,256], index: 14, kind: output, shape index: {0}]   ;;  %s1272_s15 = inlined_call_operand.vmem [shape: f32[16,128], index: 15, kind: output, shape index: {1}]  }
   0x1   :  { %22 = vsyncpa [#allocation5], 0  ;;  %s51_s20 = sshll.u32 %s1263_s6, 4  ;;  %s52_s20 = int_to_ptr.hbm [resolvable:$true] %s51_s20 }
   0x2   :  { %23 = vsyncpa [#allocation8], 0  ;;  %s1076_s21 = smov [#allocation4]   ;;  %s32_s25 = sshll.u32 %s1259_s2, 4  ;;  %s33_s25 = int_to_ptr.hbm [resolvable:$true] %s32_s25 }
   0x3   :  { %s53_s22 = sshll.u32 %s1076_s21, 4  ;;  %s1077_s26 = smov 128   ;;  %s54_s22 = int_to_ptr.vmem [resolvable:$true] %s53_s22 }
   0x4   :  { %s1078_s27 = smov 8   ;;  %s1079_s28 = smov [#allocation2]  }
   0x5   :  { %59 = dma.hbm_to_vmem [thread:$0]  %s52_s20, 2048, %s54_s22, [#allocation5], %s1077_s26, %s1077_s26, %s1078_s27  }
   0x6   :  { %s34_s29 = sshll.u32 %s1079_s28, 4  ;;  %s1080_s30 = smov 64   ;;  %s35_s29 = int_to_ptr.vmem [resolvable:$true] %s34_s29 }
   0x7   :  { %s1081_s16 = smov 4   ;;  %s70_s18 = sshll.u32 %s1267_s10, 4  ;;  %s71_s18 = int_to_ptr.hbm [resolvable:$true] %s70_s18 }
   0x8   :  { %40 = dma.hbm_to_vmem [thread:$0]  %s33_s25, 2048, %s35_s29, [#allocation3], %s1080_s30, %s1080_s30, %s1081_s16  }
   0x9   :  { %s1082_s19 = smov [#allocation6]   ;;  %s85_s24 = sshll.u32 %s1269_s12, 4  ;;  %s86_s24 = int_to_ptr.hbm [resolvable:$true] %s85_s24 }
   0xa   :  { %s72_s21 = sshll.u32 %s1082_s19, 4  ;;  %s1083_s20 = smov [#allocation7]   ;;  %s73_s21 = int_to_ptr.vmem [resolvable:$true] %s72_s21 }
   0xb   :  { %78 = dma.hbm_to_vmem [thread:$0]  %s71_s18, 1024, %s73_s21, [#allocation5], %s1080_s30, %s1080_s30, %s1081_s16  }
   0xc   :  { %s87_s22 = sshll.u32 %s1083_s20, 4  ;;  %s88_s22 = int_to_ptr.vmem [resolvable:$true] %s87_s22 }
   0xd   :  { %93 = dma.hbm_to_vmem [thread:$0]  %s86_s24, 2048, %s88_s22, [#allocation8], %s1077_s26, %s1077_s26, %s1078_s27  }
   0xe   :  { %1070 = dma.done.wait [#allocation3], 2048  }
   0xf   :  { %1071 = vsyncadd [#allocation3], 4294965248 }
  0x10   :  { %1072 = dma.done.wait [#allocation5], 3072  }
  0x11   :  { %1073 = vsyncadd [#allocation5], 4294964224 }
  0x12   :  { %1074 = dma.done.wait [#allocation8], 2048  }
  0x13   :  { %1075 = vsyncadd [#allocation8], 4294965248  ;;  %v900_v0 = vld [vmem:[#allocation2 + $0x38] sm:$0xff]  ;;  %v899_v2 = vld [vmem:[#allocation2 + $0x30] sm:$0xff]  ;;  %s1084_s18 = smov 126  }
  0x14   :  { %v908_v1 = vld [vmem:[#allocation2 + $0x78] sm:$0xff]  ;;  %255 = vmatpush.bf16.msra.mxu0 %v900_v0  ;;  %v907_v3 = vld [vmem:[#allocation2 + $0x70] sm:$0xff]  ;;  %v898_v4 = vld [vmem:[#allocation2 + $0x28] sm:$0xff] }
  0x15   :  { %269 = vmatpush.bf16.msra.mxu1 %v908_v1  ;;  %v906_v5 = vld [vmem:[#allocation2 + $0x68] sm:$0xff]  ;;  %v916_v6 = vld [vmem:[%s1261_s4 + $0x38] sm:$0xff]  ;;  %v897_v7 = vld [vmem:[#allocation2 + $0x20] sm:$0xff] }
  0x16   :  { %353 = vmatpush.bf16.msra.mxu2 %v916_v6  ;;  %v915_v8 = vld [vmem:[%s1261_s4 + $0x30] sm:$0xff]  ;;  %v905_v9 = vld [vmem:[#allocation2 + $0x60] sm:$0xff]  ;;  %v914_v10 = vld [vmem:[%s1261_s4 + $0x28] sm:$0xff] }
  0x17   :  { %v896_v11 = vld [vmem:[#allocation2 + $0x18] sm:$0xff]  ;;  %v913_v13 = vld [vmem:[%s1261_s4 + $0x20] sm:$0xff]  ;;  %v895_v14 = vld [vmem:[#allocation2 + $0x10] sm:$0xff] }
  0x18   :  { %256 = vmatpush.bf16.msra.mxu0 %v899_v2  ;;  %v904_v12 = vld [vmem:[#allocation2 + $0x58] sm:$0xff]  ;;  %v903_v15 = vld [vmem:[#allocation2 + $0x50] sm:$0xff]  ;;  %v894_v16 = vld [vmem:[#allocation2 + $0x8] sm:$0xff] }
  0x19   :  { %270 = vmatpush.bf16.msra.mxu1 %v907_v3  ;;  %v902_v17 = vld [vmem:[#allocation2 + $0x48] sm:$0xff]  ;;  %v893_v18 = vld [vmem:[#allocation2] sm:$0xff]  ;;  %v114_v21 = vld [vmem:[%s1257_s0 + $0x10] sm:$0xff] }
  0x1a   :  { %354 = vmatpush.bf16.msra.mxu2 %v915_v8  ;;  %v901_v19 = vld [vmem:[#allocation2 + $0x40] sm:$0xff]  ;;  %v113_v22 = vld [vmem:[%s1257_s0 + $0x8] sm:$0xff]  ;;  %v115_v23 = vld [vmem:[%s1257_s0 + $0x18] sm:$0xff] }
  0x1b   :  { %v112_v20 = vld [vmem:[%s1257_s0] sm:$0xff]  ;;  %v117_v25 = vpack.c.bf16 %v115_v23, %v113_v22  ;;  %v912_v26 = vld [vmem:[%s1261_s4 + $0x18] sm:$0xff]  ;;  %v911_v27 = vld [vmem:[%s1261_s4 + $0x10] sm:$0xff] }
  0x1c   :  { %257 = vmatpush.bf16.msra.mxu0 %v898_v4  ;;  %v116_v24 = vpack.c.bf16 %v114_v21, %v112_v20  ;;  %v910_v28 = vld [vmem:[%s1261_s4 + $0x8] sm:$0xff]  ;;  %v909_v29 = vld [vmem:[%s1261_s4] sm:$0xff]  ;;  %v384_v30 = vld [vmem:[#allocation4 + $0x78] sm:$0xff] }
  0x1d   :  { %271 = vmatpush.bf16.msra.mxu1 %v906_v5  ;;  %v383_v31 = vld [vmem:[#allocation4 + $0x70] sm:$0xff]  ;;  %388 = vmatpush.msra.mxu3 %v384_v30  ;;  %v382_v32 = vld [vmem:[#allocation4 + $0x68] sm:$0xff]  ;;  %v381_v33 = vld [vmem:[#allocation4 + $0x60] sm:$0xff] }
  0x1e   :  { %355 = vmatpush.bf16.msra.mxu2 %v914_v10  ;;  %v380_v34 = vld [vmem:[#allocation4 + $0x58] sm:$0xff]  ;;  %v379_v35 = vld [vmem:[#allocation4 + $0x50] sm:$0xff]  ;;  %v378_v36 = vld [vmem:[#allocation4 + $0x48] sm:$0xff] }
  0x1f   :  { %389 = vmatpush.msra.mxu3 %v383_v31  ;;  %v377_v37 = vld [vmem:[#allocation4 + $0x40] sm:$0xff]  ;;  %v376_v38 = vld [vmem:[#allocation4 + $0x38] sm:$0xff]  ;;  %v375_v42 = vld [vmem:[#allocation4 + $0x30] sm:$0xff] }
  0x20   :  { %258 = vmatpush.bf16.msra.mxu0 %v897_v7  ;;  %v955_v41 = vld [vmem:[%s1260_s3] ss:$0 sm:$0xff]  ;;  %v374_v43 = vld [vmem:[#allocation4 + $0x28] sm:$0xff]  ;;  %v372_v46 = vld [vmem:[#allocation4 + $0x18] sm:$0xff] }
  0x21   :  { %272 = vmatpush.bf16.msra.mxu1 %v905_v9  ;;  %390 = vmatpush.msra.mxu3 %v382_v32  ;;  %v373_v45 = vld [vmem:[#allocation4 + $0x20] sm:$0xff]  ;;  %v371_v55 = vld [vmem:[#allocation4 + $0x10] sm:$0xff]  ;;  %v370_v56 = vld [vmem:[#allocation4 + $0x8] sm:$0xff] }
  0x22   :  { %356 = vmatpush.bf16.msra.mxu2 %v913_v13  ;;  %v369_v57 = vld [vmem:[#allocation4] sm:$0xff]  ;;  %v1086_v13 = vmov 0   ;;  %v924_v22 = vld [vmem:[#allocation6 + $0x38] sm:$0xff]  ;;  %v923_v23 = vld [vmem:[#allocation6 + $0x30] sm:$0xff] }
  0x23   :  { %391 = vmatpush.msra.mxu3 %v381_v33  ;;  %v956_v58 = vld [vmem:[%s1262_s5] ss:$0 sm:$0xff]  ;;  %952 = vset.pattern.permute.xlu1 %v1086_v13  ;;  %v887_v30 = vld [vmem:[#allocation7 + $0x70] sm:$0xf]  ;;  %v940_v31 = vld [vmem:[#allocation7 + $0x74] sm:$0xf0] }
  0x24   :  { %259 = vmatpush.bf16.msra.mxu0 %v896_v11  ;;  %v957_v1 = vld [vmem:[%s1264_s7] ss:$0 sm:$0xff]  ;;  %v939_v32 = vld [vmem:[#allocation7 + $0x74] sm:$0xf]  ;;  %v888_v33 = vor.u32 %v940_v31, %v887_v30  ;;  %v833_v30 = vld [vmem:[#allocation7 + $0x8] sm:$0xf0] }
  0x25   :  { %273 = vmatpush.bf16.msra.mxu1 %v904_v12  ;;  %392 = vmatpush.msra.mxu3 %v380_v34  ;;  %v1085_v12 = vmov 1   ;;  %v889_v34 = vld [vmem:[#allocation7 + $0x78] sm:$0xf0] }
  0x26   :  { %357 = vmatpush.bf16.msra.mxu2 %v912_v26  ;;  %953 = vset.pattern.permute.xlu2 %v1085_v12  ;;  %v920_v26 = vld [vmem:[#allocation6 + $0x18] sm:$0xff] }
  0x27   :  { %393 = vmatpush.msra.mxu3 %v379_v35  ;;  %954 = vset.pattern.permute.xlu0 %v1085_v12  ;;  %v879_v35 = vld [vmem:[#allocation7 + $0x60] sm:$0xf]  ;;  %v857_v12 = vld [vmem:[#allocation7 + $0x38] sm:$0xf0] }
  0x28   :  { %260 = vmatpush.bf16.msra.mxu0 %v895_v14  ;;  %v413_v14 = vld [vmem:[%s1258_s1] sm:$0xff] }
  0x29   :  { %274 = vmatpush.bf16.msra.mxu1 %v903_v15  ;;  %394 = vmatpush.msra.mxu3 %v378_v36  ;;  %v938_v36 = vld [vmem:[#allocation7 + $0x64] sm:$0xf0] }
  0x2a   :  { %358 = vmatpush.bf16.msra.mxu2 %v911_v27  ;;  %v919_v27 = vld [vmem:[#allocation6 + $0x10] sm:$0xff] }
  0x2b   :  { %395 = vmatpush.msra.mxu3 %v377_v37  ;;  %v892_v37 = vor.u32 %v939_v32, %v889_v34 }
  0x2c   :  { %261 = vmatpush.bf16.msra.mxu0 %v894_v16 }
  0x2d   :  { %275 = vmatpush.bf16.msra.mxu1 %v902_v17  ;;  %396 = vmatpush.msra.mxu3 %v376_v38  ;;  %v937_v38 = vld [vmem:[#allocation7 + $0x64] sm:$0xf] }
  0x2e   :  { %359 = vmatpush.bf16.msra.mxu2 %v910_v28  ;;  %v918_v28 = vld [vmem:[#allocation6 + $0x8] sm:$0xff] }
  0x2f   :  { %397 = vmatpush.msra.mxu3 %v375_v42  ;;  %v871_v42 = vld [vmem:[#allocation7 + $0x50] sm:$0xf] }
  0x30   :  { %262 = vmatpush.bf16.msra.mxu0 %v893_v18  ;;  %v414_v18 = vld [vmem:[%s1258_s1 + $0x8] sm:$0xff] }
  0x31   :  { %276 = vmatpush.bf16.msra.mxu1 %v901_v19  ;;  %398 = vmatpush.msra.mxu3 %v374_v43  ;;  %v936_v43 = vld [vmem:[#allocation7 + $0x54] sm:$0xf0] }
  0x32   :  { %360 = vmatpush.bf16.msra.mxu2 %v909_v29  ;;  %v917_v29 = vld [vmem:[#allocation6] sm:$0xff] }
  0x33   :  { %263 = vmatmul.bf16.vlgmr.msra.gmra.mxu0 %v116_v24  ;;  %399 = vmatpush.msra.mxu3 %v373_v45  ;;  %v922_v24 = vld [vmem:[#allocation6 + $0x28] sm:$0xff]  ;;  %v873_v45 = vld [vmem:[#allocation7 + $0x58] sm:$0xf0] }
  0x34   :  { %277 = vmatmul.bf16.vlgmr.msra.gmra.mxu1 %v117_v25  ;;  %536 = vmatpush.bf16.msrb.mxu0 %v924_v22  ;;  %v921_v25 = vld [vmem:[#allocation6 + $0x20] sm:$0xff]  ;;  %v927_v22 = vld [vmem:[#allocation7 + $0x14] sm:$0xf] }
  0x35   :  { %400 = vmatpush.msra.mxu3 %v372_v46  ;;  %654 = vmatpush.bf16.msrb.mxu1 %v888_v33  ;;  %v872_v46 = vor.u32 %v936_v43, %v871_v42  ;;  %v961_v33 = vld [vmem:[%s1268_s11] ss:$0 sm:$0xff] }
  0x36   :  { %668 = vmatpush.bf16.msrb.mxu2 %v892_v37 }
  0x37   :  { %401 = vmatpush.msra.mxu3 %v371_v55 }
  0x38   :  { %537 = vmatpush.bf16.msrb.mxu0 %v923_v23 }
  0x39   :  { %402 = vmatpush.msra.mxu3 %v370_v56 }
  0x3b   :  { %403 = vmatpush.msra.mxu3 %v369_v57  ;;  %v960_v57 = vld [vmem:[%s1266_s9] ss:$0 sm:$0xff] }
  0x3c   :  { %538 = vmatpush.bf16.msrb.mxu0 %v922_v24  ;;  %v841_v24 = vld [vmem:[#allocation7 + $0x18] sm:$0xf0] }
  0x40   :  { %539 = vmatpush.bf16.msrb.mxu0 %v921_v25  ;;  %v844_v25 = vor.u32 %v927_v22, %v841_v24 }
  0x44   :  { %540 = vmatpush.bf16.msrb.mxu0 %v920_v26  ;;  %v831_v26 = vld [vmem:[#allocation7] sm:$0xf] }
  0x48   :  { %541 = vmatpush.bf16.msrb.mxu0 %v919_v27  ;;  %v926_v27 = vld [vmem:[#allocation7 + $0x4] sm:$0xf0] }
  0x4c   :  { %542 = vmatpush.bf16.msrb.mxu0 %v918_v28  ;;  %v925_v28 = vld [vmem:[#allocation7 + $0x4] sm:$0xf] }
  0x4d   :  { %v836_v31 = vor.u32 %v925_v28, %v833_v30 }
  0x50   :  { %543 = vmatpush.bf16.msrb.mxu0 %v917_v29  ;;  %v832_v29 = vor.u32 %v926_v27, %v831_v26 }
  0xb0   :  { %v264_v39 = vpop.f32.mrf.mxu0 }
  0xb1   :  { %v278_v40 = vpop.f32.mrf.mxu1  ;;  %v265_v44 = vadd.f32 %v955_v41, %v264_v39  ;;  %v881_v39 = vld [vmem:[#allocation7 + $0x68] sm:$0xf0] }
  0xb3   :  { %v279_v48 = vadd.f32 %v278_v40, %v265_v44  ;;  %v880_v40 = vor.u32 %v938_v36, %v879_v35  ;;  %v935_v44 = vld [vmem:[#allocation7 + $0x54] sm:$0xf] }
  0xb5   :  { %v283_v52 = vmax.f32 %v279_v48, 0.0  ;;  %655 = vmatpush.bf16.msrb.mxu1 %v880_v40  ;;  %v863_v48 = vld [vmem:[#allocation7 + $0x40] sm:$0xf] }
  0xb6   :  { %v123_v40 = vld [vmem:[%s1270_s13] sm:$0x3] }
  0xb7   :  { %v571_v43 = vperm.slane %v123_v40, 1 }
  0xb8   :  { %v266_v47 = vpop.f32.mrf.mxu0 }
  0xb9   :  { %v267_v49 = vadd.f32 %v955_v41, %v266_v47  ;;  %v280_v50 = vpop.f32.mrf.mxu1  ;;  %v884_v41 = vor.u32 %v937_v38, %v881_v39  ;;  %v876_v47 = vor.u32 %v935_v44, %v873_v45  ;;  %656 = vmatpush.bf16.msrb.mxu1 %v872_v46 }
  0xbb   :  { %v281_v51 = vadd.f32 %v280_v50, %v267_v49  ;;  %669 = vmatpush.bf16.msrb.mxu2 %v884_v41  ;;  %v934_v49 = vld [vmem:[#allocation7 + $0x44] sm:$0xf0]  ;;  %v933_v50 = vld [vmem:[#allocation7 + $0x44] sm:$0xf]  ;;  %v570_v41 = vperm.slane %v123_v40, 0 }
  0xbd   :  { %v284_v53 = vmax.f32 %v281_v51, 0.0  ;;  %v865_v51 = vld [vmem:[#allocation7 + $0x48] sm:$0xf0] }
  0xbe   :  { %v868_v55 = vor.u32 %v933_v50, %v865_v51 }
  0xbf   :  { %v285_v54 = vpack.c.bf16 %v284_v53, %v283_v52  ;;  %v864_v53 = vor.u32 %v934_v49, %v863_v48  ;;  %670 = vmatpush.bf16.msrb.mxu2 %v876_v47 }
  0xc1   :  { %361 = vmatmul.bf16.vlgmr.msra.gmra.mxu2 %v285_v54  ;;  %v959_v54 = vld [vmem:[%s1265_s8] ss:$0 sm:$0xff]  ;;  %657 = vmatpush.bf16.msrb.mxu1 %v864_v53 }
  0xc3   :  { %671 = vmatpush.bf16.msrb.mxu2 %v868_v55 }
 0x144   :  { %v362_v59 = vpop.f32.mrf.mxu2 }
 0x145   :  { %v363_v60 = vadd.f32 %v956_v58, %v362_v59  ;;  %v958_v59 = vld [vmem:[%s1265_s8 + $0x1] ss:$0 sm:$0xff] }
 0x147   :  { %v367_v61 = vmax.f32 %v363_v60, 0.0 }
 0x149   :  { %404 = vmatmul.f32.vlgmr.msra.gmra.mxu3 %v367_v61 }
 0x14c   :  { %v364_v62 = vpop.f32.mrf.mxu2 }
 0x14d   :  { %v365_v63 = vadd.f32 %v956_v58, %v364_v62 }
 0x14f   :  { %v368_v0 = vmax.f32 %v365_v63, 0.0 }
 0x151   :  { %407 = vmatmul.f32.gmra.mxu3 %v368_v0 }
 0x1cc   :  { %v405_v2 = vpop.f32.mrf.mxu3 }
 0x1cd   :  { %v406_v3 = vadd.f32 %v957_v1, %v405_v2 }
 0x1cf   :  { %411 = vst [vmem:[%s1272_s15] sm:$0xff] %v406_v3  ;;  %v415_v4 = vmul.f32 0.5, %v406_v3 }
 0x1d1   :  { %v417_v5 = vmul.f32 1.442695, %v415_v4 }
 0x1d3   :  { %962 = vpow2.f32 %v417_v5 }
 0x1d4   :  { %v408_v6 = vpop.f32.mrf.mxu3 }
 0x1d5   :  { %v409_v7 = vadd.f32 %v957_v1, %v408_v6 }
 0x1d7   :  { %412 = vst [vmem:[%s1272_s15 + $0x8] sm:$0xff] %v409_v7  ;;  %v416_v8 = vmul.f32 0.5, %v409_v7 }
 0x1d9   :  { %v963_v9 = vpop.eup %962  ;;  %v419_v10 = vmul.f32 1.442695, %v416_v8  ;;  %v855_v8 = vld [vmem:[#allocation7 + $0x30] sm:$0xf] }
 0x1da   :  { %423 = vrot.lane.b32.xlu0 %v963_v9, %s1084_s18  ;;  %v932_v9 = vld [vmem:[#allocation7 + $0x34] sm:$0xf0] }
 0x1db   :  { %964 = vpow2.f32 %v419_v10  ;;  %v931_v10 = vld [vmem:[#allocation7 + $0x34] sm:$0xf] }
 0x1dc   :  { %v860_v13 = vor.u32 %v931_v10, %v857_v12 }
 0x1de   :  { %672 = vmatpush.bf16.msrb.mxu2 %v860_v13 }
 0x1e1   :  { %v965_v11 = vpop.eup %964 }
 0x1e2   :  { %425 = vrot.lane.b32.xlu0 %v965_v11, %s1084_s18  ;;  %v856_v11 = vor.u32 %v932_v9, %v855_v8 }
 0x1e4   :  { %658 = vmatpush.bf16.msrb.mxu1 %v856_v11 }
 0x24c   :  { %v424_v15 = vpop.permute.xlu0 %423 }
 0x24d   :  { %v429_v16 = vmul.f32 %v424_v15, %v413_v14  ;;  %v847_v14 = vld [vmem:[#allocation7 + $0x20] sm:$0xf]  ;;  %v930_v15 = vld [vmem:[#allocation7 + $0x24] sm:$0xf0] }
 0x24f   :  { %v431_v17 = vadd.f32 %v429_v16, %v406_v3  ;;  %v929_v16 = vld [vmem:[#allocation7 + $0x24] sm:$0xf] }
 0x251   :  { %454 = vperm.xlu2 %953, %v431_v17   ;;  %436 = vperm.xlu1 %952, %v431_v17   ;;  %v848_v17 = vor.u32 %v930_v15, %v847_v14 }
 0x253   :  { %659 = vmatpush.bf16.msrb.mxu1 %v848_v17 }
 0x254   :  { %v426_v19 = vpop.permute.xlu0 %425 }
 0x255   :  { %v430_v20 = vmul.f32 %v426_v19, %v414_v18  ;;  %v849_v18 = vld [vmem:[#allocation7 + $0x28] sm:$0xf0] }
 0x256   :  { %v852_v19 = vor.u32 %v929_v16, %v849_v18 }
 0x257   :  { %v432_v21 = vadd.f32 %v430_v20, %v409_v7  ;;  %v839_v20 = vld [vmem:[#allocation7 + $0x10] sm:$0xf] }
 0x258   :  { %673 = vmatpush.bf16.msrb.mxu2 %v852_v19 }
 0x259   :  { %458 = vperm.xlu2 %953, %v432_v21   ;;  %441 = vperm.xlu1 %952, %v432_v21   ;;  %v928_v21 = vld [vmem:[#allocation7 + $0x14] sm:$0xf0] }
 0x25a   :  { %v840_v23 = vor.u32 %v928_v21, %v839_v20 }
 0x25c   :  { %660 = vmatpush.bf16.msrb.mxu1 %v840_v23  ;;  %674 = vmatpush.bf16.msrb.mxu2 %v844_v25 }
 0x260   :  { %661 = vmatpush.bf16.msrb.mxu1 %v832_v29  ;;  %675 = vmatpush.bf16.msrb.mxu2 %v836_v31 }
 0x2ab   :  { %v455_v52 = vpop.permute.xlu2 %454 }
 0x2ac   :  { %v462_v63 = vmul.f32 %v958_v59, %v455_v52 }
 0x2b3   :  { %v459_v61 = vpop.permute.xlu2 %458 }
 0x2b4   :  { %v463_v1 = vmul.f32 %v958_v59, %v459_v61 }
 0x2c3   :  { %v437_v56 = vpop.permute.xlu1 %436 }
 0x2c4   :  { %v445_v58 = vmul.f32 %v959_v54, %v437_v56 }
 0x2c6   :  { %v450_v60 = vadd.f32 %v960_v57, %v445_v58 }
 0x2c8   :  { %v464_v2 = vadd.f32 %v462_v63, %v450_v60 }
 0x2ca   :  { %v466_v5 = vmax.f32 %v464_v2, 0.0 }
 0x2cb   :  { %v442_v62 = vpop.permute.xlu1 %441 }
 0x2cc   :  { %v446_v0 = vmul.f32 %v959_v54, %v442_v62 }
 0x2ce   :  { %v451_v3 = vadd.f32 %v960_v57, %v446_v0 }
 0x2d0   :  { %v465_v4 = vadd.f32 %v463_v1, %v451_v3 }
 0x2d2   :  { %v467_v6 = vmax.f32 %v465_v4, 0.0 }
 0x2d4   :  { %v468_v7 = vpack.c.bf16 %v467_v6, %v466_v5 }
 0x2d6   :  { %544 = vmatmul.bf16.vlgmr.msrb.gmra.mxu0 %v468_v7 }
 0x353   :  { %v545_v32 = vpop.f32.mrf.mxu0 }
 0x354   :  { %v546_v34 = vadd.f32 %v961_v33, %v545_v32 }
 0x356   :  { %v550_v37 = vmax.f32 %v546_v34, 0.0 }
 0x35b   :  { %v547_v35 = vpop.f32.mrf.mxu0 }
 0x35c   :  { %v548_v36 = vadd.f32 %v961_v33, %v547_v35 }
 0x35e   :  { %v551_v38 = vmax.f32 %v548_v36, 0.0 }
 0x360   :  { %v552_v39 = vpack.c.bf16 %v551_v38, %v550_v37 }
 0x362   :  { %662 = vmatmul.bf16.vlgmr.msrb.gmra.mxu1 %v552_v39  ;;  %676 = vmatmul.bf16.vlgmr.msrb.gmra.mxu2 %v552_v39 }
 0x3df   :  { %v663_v42 = vpop.f32.mrf.mxu1 }
 0x3e0   :  { %v664_v44 = vadd.f32 %v663_v42, %v570_v41 }
 0x3e2   :  { %966 = vtanh.f32 %v664_v44 }
 0x3e5   :  { %v677_v45 = vpop.f32.mrf.mxu2 }
 0x3e6   :  { %v678_v46 = vadd.f32 %v677_v45, %v571_v43 }
 0x3e7   :  { %v665_v47 = vpop.f32.mrf.mxu1 }
 0x3e8   :  { %968 = vtanh.f32 %v678_v46  ;;  %v666_v48 = vadd.f32 %v665_v47, %v570_v41  ;;  %v967_v49 = vpop.eup %966 }
 0x3ea   :  { %970 = vtanh.f32 %v666_v48 }
 0x3ed   :  { %v679_v50 = vpop.f32.mrf.mxu2 }
 0x3ee   :  { %v969_v51 = vpop.eup %968  ;;  %v680_v52 = vadd.f32 %v679_v50, %v571_v43 }
 0x3ef   :  { %v686_v53 = vpack.c.bf16 %v969_v51, %v967_v49 }
 0x3f0   :  { %972 = vtanh.f32 %v680_v52  ;;  %v971_v54 = vpop.eup %970 }
 0x3f1   :  { %688 = vst [vmem:[%s1271_s14] sm:$0xff] %v686_v53 }
 0x3f6   :  { %v973_v55 = vpop.eup %972 }
 0x3f7   :  { %v687_v56 = vpack.c.bf16 %v973_v55, %v971_v54 }
 0x3f9   :  { %689 = vst [vmem:[%s1271_s14 + $0x8] sm:$0xff] %v687_v56 }
 0x3fa   :  { %698 = vsyncpa [#allocation3], 1 }
 0x3fb   :  { %699 = vsyncpa [#allocation5], 1 }
 0x3fc   :  { %700 = vsyncpa [#allocation8], 1 }

</bundles_post_ra>
